<compile_context>
chip_gen: v7x
topology: tpu7x:2x2x1
jax: 0.10.0
libtpu: 0.0.40
codegen_flags: <defaults>
</compile_context>

<pallas_src>
import numpy as np
import jax
import jax.numpy as jnp
from jax.experimental import pallas as pl
from jax.experimental.pallas import tpu as pltpu

_LANE = 128
_VMEM_LIMIT = 48 * 1024 * 1024   # fits v5e/v6e (128 MiB) and v7x (64 MiB) VMEM
_ACT_DTYPE = jnp.bfloat16        # activations/weights; accumulation is f32


# ---------------------------------------------------------------------------
# Small helpers
# ---------------------------------------------------------------------------
def _round_up(x, m):
  return (x + m - 1) // m * m


def _pad_to(a, shape, value=0.0):
  pads = [(0, t - s) for s, t in zip(a.shape, shape)]
  if not any(p[1] for p in pads):
    return a
  return jnp.pad(a, pads, constant_values=value)


def _choose_bm(m, target=512):
  """Row-tile size: one big lane/sublane-dense tile (no forced split)."""
  return max(16, _round_up(min(target, m), 16))


def _compiler_params():
  return pltpu.CompilerParams(dimension_semantics=("parallel",),
                              vmem_limit_bytes=_VMEM_LIMIT)


def fold_bn(gamma, beta, mean, var, bias=None, eps=1e-5):
  """Fold BN (and optionally the preceding conv bias) into scale/shift."""
  scale = gamma / jnp.sqrt(var + eps)
  shift = beta - mean * scale
  if bias is not None:
    shift = shift + bias * scale
  return scale, shift


# ---------------------------------------------------------------------------
# Pallas kernels
# ---------------------------------------------------------------------------
def _pw1_halo_kernel(x_ref, w_ref, scale_ref, shift_ref, o_ref):
  """1x1 conv (matmul) + folded BN/bias + ReLU, written into the interior of a
  zero halo-padded (1, H+2, W+2, Cout) output block (no host-side pad)."""
  _, hs, ws, cin = x_ref.shape
  cout = o_ref.shape[-1]
  x2 = x_ref[0].reshape(hs * ws, cin)
  y = jnp.dot(x2, w_ref[...], preferred_element_type=jnp.float32)
  y = jnp.maximum(y * scale_ref[...] + shift_ref[...], 0.0)
  o_ref[...] = jnp.zeros(o_ref.shape, o_ref.dtype)
  o_ref[0, 1:1 + hs, 1:1 + ws, :] = y.reshape(hs, ws, cout).astype(o_ref.dtype)


def _conv3x3_kernel(xp_ref, w_ref, scale_ref, shift_ref, o_ref):
  """3x3 conv (pad=1, stride=1) + BN + ReLU.

  xp_ref: (1, H+2, W+2, C) halo-padded block; o_ref: (1, H, W, C).
  The 9 taps are a chained sum of matmul results (MXU/register accumulation,
  no VMEM scratch). The 3 width (sublane) shifts are hoisted out of the dy
  loop; the H slices are free leading-dim address offsets.
  """
  _, hs, ws, c = o_ref.shape
  xp = xp_ref[0]                                       # (H+2, W+2, C)
  slabs = [xp[:, dx:dx + ws, :] for dx in range(3)]    # 3 shifted slabs, not 9
  acc = None
  for dy in range(3):
    for dx in range(3):
      patch = slabs[dx][dy:dy + hs].reshape(hs * ws, c)  # free: ws % 8 == 0
      contrib = jnp.dot(patch, w_ref[dy, dx],
                        preferred_element_type=jnp.float32)
      acc = contrib if acc is None else acc + contrib
  y = jnp.maximum(acc * scale_ref[...] + shift_ref[...], 0.0)
  o_ref[0] = y.reshape(hs, ws, c).astype(o_ref.dtype)


def _pw_res_proj_kernel(x_ref, w_ref, scale_ref, res_ref, wres_ref,
                        shift_ref, o_ref):
  """1x1 conv + BN + fused residual 1x1 projection + add + ReLU."""
  y = jnp.dot(x_ref[...], w_ref[...], preferred_element_type=jnp.float32)
  y = y * scale_ref[...]
  y = y + jnp.dot(res_ref[...], wres_ref[...],
                  preferred_element_type=jnp.float32)
  y = y + shift_ref[...]          # bn3 shift (incl. b3) + residual conv bias
  o_ref[...] = jnp.maximum(y, 0.0).astype(o_ref.dtype)


def _pw_res_add_kernel(x_ref, w_ref, scale_ref, shift_ref, res_ref, o_ref):
  """1x1 conv + BN + plain residual add + ReLU."""
  y = jnp.dot(x_ref[...], w_ref[...], preferred_element_type=jnp.float32)
  y = y * scale_ref[...] + shift_ref[...] + res_ref[...].astype(jnp.float32)
  o_ref[...] = jnp.maximum(y, 0.0).astype(o_ref.dtype)


# ---------------------------------------------------------------------------
# pallas_call wrappers
# ---------------------------------------------------------------------------
def pw_conv_bn_halo(x, w, scale, shift):
  """x: (N, H, W, Cin) bf16 -> (N, H+2, W+2, Cout) bf16 with zeroed halo."""
  n, hs, ws, cin = x.shape
  cout = w.shape[1]
  return pl.pallas_call(
      _pw1_halo_kernel,
      out_shape=jax.ShapeDtypeStruct((n, hs + 2, ws + 2, cout), _ACT_DTYPE),
      grid=(n,),
      in_specs=[
          pl.BlockSpec((1, hs, ws, cin), lambda i: (i, 0, 0, 0)),
          pl.BlockSpec((cin, cout), lambda i: (0, 0)),
          pl.BlockSpec((1, cout), lambda i: (0, 0)),
          pl.BlockSpec((1, cout), lambda i: (0, 0)),
      ],
      out_specs=pl.BlockSpec((1, hs + 2, ws + 2, cout), lambda i: (i, 0, 0, 0)),
      compiler_params=_compiler_params(),
  )(x, w, scale.reshape(1, -1), shift.reshape(1, -1))


def conv3x3_bn_relu(xpad, w2, scale, shift):
  """xpad: (N, H+2, W+2, C) halo-padded NHWC bf16; w2: (3, 3, C, C) HWIO."""
  n, hp, wp, c = xpad.shape
  hs, ws = hp - 2, wp - 2
  return pl.pallas_call(
      _conv3x3_kernel,
      out_shape=jax.ShapeDtypeStruct((n, hs, ws, c), _ACT_DTYPE),
      grid=(n,),
      in_specs=[
          pl.BlockSpec((1, hp, wp, c), lambda i: (i, 0, 0, 0)),
          pl.BlockSpec((3, 3, c, c), lambda i: (0, 0, 0, 0)),
          pl.BlockSpec((1, c), lambda i: (0, 0)),
          pl.BlockSpec((1, c), lambda i: (0, 0)),
      ],
      out_specs=pl.BlockSpec((1, hs, ws, c), lambda i: (i, 0, 0, 0)),
      compiler_params=_compiler_params(),
  )(xpad, w2, scale.reshape(1, -1), shift.reshape(1, -1))


def pw_conv_bn_res_proj(x2d, w, scale, res2d, wres, shift):
  """Fused: relu(dot(x2d,w)*scale + dot(res2d,wres) + shift), f32 output."""
  m, cin = x2d.shape
  cout = w.shape[1]
  cres = res2d.shape[1]
  bm = _choose_bm(m)
  grid = pl.cdiv(m, bm)
  m_pad = grid * bm
  x2d_p = _pad_to(x2d, (m_pad, cin))
  res2d_p = _pad_to(res2d, (m_pad, cres))
  out = pl.pallas_call(
      _pw_res_proj_kernel,
      out_shape=jax.ShapeDtypeStruct((m_pad, cout), jnp.float32),
      grid=(grid,),
      in_specs=[
          pl.BlockSpec((bm, cin), lambda i: (i, 0)),
          pl.BlockSpec((cin, cout), lambda i: (0, 0)),
          pl.BlockSpec((1, cout), lambda i: (0, 0)),
          pl.BlockSpec((bm, cres), lambda i: (i, 0)),
          pl.BlockSpec((cres, cout), lambda i: (0, 0)),
          pl.BlockSpec((1, cout), lambda i: (0, 0)),
      ],
      out_specs=pl.BlockSpec((bm, cout), lambda i: (i, 0)),
      compiler_params=_compiler_params(),
  )(x2d_p, w, scale.reshape(1, -1), res2d_p, wres, shift.reshape(1, -1))
  return out[:m] if m_pad != m else out


def pw_conv_bn_res_add(x2d, w, scale, shift, res2d):
  """Fused: relu(dot(x2d,w)*scale + shift + res2d), f32 output."""
  m, cin = x2d.shape
  cout = w.shape[1]
  bm = _choose_bm(m)
  grid = pl.cdiv(m, bm)
  m_pad = grid * bm
  x2d_p = _pad_to(x2d, (m_pad, cin))
  res2d_p = _pad_to(res2d, (m_pad, cout))
  out = pl.pallas_call(
      _pw_res_add_kernel,
      out_shape=jax.ShapeDtypeStruct((m_pad, cout), jnp.float32),
      grid=(grid,),
      in_specs=[
          pl.BlockSpec((bm, cin), lambda i: (i, 0)),
          pl.BlockSpec((cin, cout), lambda i: (0, 0)),
          pl.BlockSpec((1, cout), lambda i: (0, 0)),
          pl.BlockSpec((1, cout), lambda i: (0, 0)),
          pl.BlockSpec((bm, cout), lambda i: (i, 0)),
      ],
      out_specs=pl.BlockSpec((bm, cout), lambda i: (i, 0)),
      compiler_params=_compiler_params(),
  )(x2d_p, w, scale.reshape(1, -1), shift.reshape(1, -1), res2d_p)
  return out[:m] if m_pad != m else out


# ---------------------------------------------------------------------------
# Bottleneck forward (Pallas)
# ---------------------------------------------------------------------------
def bottleneck_forward(x_nchw, p, *, stride=1, is_conv2_0=False):
  """Pallas Bottlececk.forward. x_nchw: (N, Cin, H, W) -> (N, 4*Cout, H/s, W/s)."""
  assert stride in (1, 2), "only stride 1 / 2 supported (as used by ResNet)"
  x = jnp.transpose(x_nchw, (0, 2, 3, 1))            # NCHW -> NHWC (boundary only)
  n, h, w, cin = x.shape
  cm = p["w1"].shape[1]
  c4 = 4 * cm
  cm_p = _round_up(cm, _LANE)
  c4_p = _round_up(c4, _LANE)

  # ---- fold BN + conv bias into per-channel f32 scale/shift; pad to lane width
  s1, t1 = fold_bn(p["bn1_g"], p["bn1_b"], p["bn1_m"], p["bn1_v"], p["b1"])
  s2, t2 = fold_bn(p["bn2_g"], p["bn2_b"], p["bn2_m"], p["bn2_v"], p["b2"])
  s3, t3 = fold_bn(p["bn3_g"], p["bn3_b"], p["bn3_m"], p["bn3_v"], p["b3"])
  s1 = _pad_to(s1, (cm_p,), 1.0); t1 = _pad_to(t1, (cm_p,))
  s2 = _pad_to(s2, (cm_p,), 1.0); t2 = _pad_to(t2, (cm_p,))
  s3 = _pad_to(s3, (c4_p,), 1.0); t3 = _pad_to(t3, (c4_p,))

  # padded weight columns are exact zeros so padded lanes stay exact zeros
  w1 = _pad_to(p["w1"], (cin, cm_p)).astype(_ACT_DTYPE)
  w2 = _pad_to(p["w2"], (3, 3, cm_p, cm_p)).astype(_ACT_DTYPE)
  w3 = _pad_to(p["w3"], (cm_p, c4_p)).astype(_ACT_DTYPE)

  x_bf = x.astype(_ACT_DTYPE)
  # TODO(synk): fold the stride-2 subsample into the kernel DMA instead of a
  #             host-side strided slice.
  xs = x_bf if stride == 1 else x_bf[:, ::stride, ::stride, :]
  ns, hs, ws, _ = xs.shape
  m = ns * hs * ws

  # ---- block1: 1x1 conv (stride) + bn1 + relu, written into a halo-padded
  #      NHWC buffer (no separate jnp.pad HBM round trip)
  h1p = pw_conv_bn_halo(xs, w1, s1, t1)              # (ns, hs+2, ws+2, cm_p)

  # ---- block2: 3x3 conv (pad=1) + bn2 + relu, 9-tap MXU accumulation
  h2 = conv3x3_bn_relu(h1p, w2, s2, t2)              # (ns, hs, ws, cm_p)
  h2_2d = h2.reshape(m, cm_p)

  # ---- block3: 1x1 conv + bn3 + residual (projection fused in-kernel) + relu
  if is_conv2_0 and stride == 1:
    w_res = _pad_to(p["w_id"], (cin, c4_p)).astype(_ACT_DTYPE)
    b_res = _pad_to(p["b_id"], (c4_p,))
    out2d = pw_conv_bn_res_proj(h2_2d, w3, s3, xs.reshape(m, cin), w_res,
                                t3 + b_res)
  elif stride != 1 and not is_conv2_0:
    w_res = _pad_to(p["w_ds"], (cin, c4_p)).astype(_ACT_DTYPE)
    b_res = _pad_to(p["b_ds"], (c4_p,))
    out2d = pw_conv_bn_res_proj(h2_2d, w3, s3, xs.reshape(m, cin), w_res,
                                t3 + b_res)
  elif stride == 1 and not is_conv2_0:
    # plain residual (requires cin == 4*cm, exactly as the PyTorch module does)
    assert cin == c4, ("plain residual path requires input_dim == 4*output_dim "
                       f"(got {cin} vs {c4})")
    res2d = _pad_to(xs.reshape(m, cin), (m, c4_p))
    out2d = pw_conv_bn_res_add(h2_2d, w3, s3, t3, res2d)
  else:
    # TODO(synk): is_conv2_0 AND stride!=1 hits a channel-mismatch bug in the
    #             reference module (downsampling conv expects input_dim
    #             channels after the x4 projection); not supported here either.
    raise NotImplementedError("is_conv2_0 with stride != 1 is unsupported")

  out = out2d.reshape(ns, hs, ws, c4_p)[..., :c4]
  return jnp.transpose(out, (0, 3, 1, 2))            # NHWC -> NCHW


# ---------------------------------------------------------------------------
# Pure-JAX f32 reference (for correctness check)
# ---------------------------------------------------------------------------
def _conv_ref(x, w_hwio, b, stride=1, pad=0):
  y = jax.lax.conv_general_dilated(
      x, w_hwio, window_strides=(stride, stride),
      padding=[(pad, pad), (pad, pad)],
      dimension_numbers=("NHWC", "HWIO", "NHWC"))
  return y + b


def bottleneck_ref(x_nchw, p, *, stride=1, is_conv2_0=False):
  x = jnp.transpose(x_nchw, (0, 2, 3, 1))
  identity = x
  if is_conv2_0:
    identity = _conv_ref(identity, p["w_id"].reshape(1, 1, *p["w_id"].shape),
                         p["b_id"])
  s1, t1 = fold_bn(p["bn1_g"], p["bn1_b"], p["bn1_m"], p["bn1_v"])
  s2, t2 = fold_bn(p["bn2_g"], p["bn2_b"], p["bn2_m"], p["bn2_v"])
  s3, t3 = fold_bn(p["bn3_g"], p["bn3_b"], p["bn3_m"], p["bn3_v"])
  h = _conv_ref(x, p["w1"].reshape(1, 1, *p["w1"].shape), p["b1"],
                stride=stride)
  h = jnp.maximum(h * s1 + t1, 0.0)
  h = _conv_ref(h, p["w2"], p["b2"], stride=1, pad=1)
  h = jnp.maximum(h * s2 + t2, 0.0)
  h = _conv_ref(h, p["w3"].reshape(1, 1, *p["w3"].shape), p["b3"])
  h = h * s3 + t3
  if stride != 1:
    identity = _conv_ref(identity, p["w_ds"].reshape(1, 1, *p["w_ds"].shape),
                         p["b_ds"], stride=2)
  out = jnp.maximum(h + identity, 0.0)
  return jnp.transpose(out, (0, 3, 1, 2))


# ---------------------------------------------------------------------------
# Deterministic parameter construction
# ---------------------------------------------------------------------------
def init_params(key, input_dim, output_dim):
  c4 = output_dim * 4
  keys = jax.random.split(key, 16)

  def nrm(k, shape, s=0.2):
    return s * jax.random.normal(k, shape, jnp.float32)

  return {
      # conv weights stored channels-last: 1x1 -> (Cin, Cout); 3x3 -> HWIO
      "w1": nrm(keys[0], (input_dim, output_dim)),
      "b1": nrm(keys[1], (output_dim,)),
      "w2": nrm(keys[2], (3, 3, output_dim, output_dim)),
      "b2": nrm(keys[3], (output_dim,)),
      "w3": nrm(keys[4], (output_dim, c4)),
      "b3": nrm(keys[5], (c4,)),
      "w_id": nrm(keys[6], (input_dim, c4)),
      "b_id": nrm(keys[7], (c4,)),
      "w_ds": nrm(keys[8], (input_dim, c4)),
      "b_ds": nrm(keys[9], (c4,)),
      # BatchNorm (inference-mode) parameters
      "bn1_g": 1.0 + nrm(keys[10], (output_dim,), 0.1),
      "bn1_b": nrm(keys[10], (output_dim,), 0.1),
      "bn1_m": nrm(keys[11], (output_dim,), 0.1),
      "bn1_v": 0.5 + jax.random.uniform(keys[11], (output_dim,)),
      "bn2_g": 1.0 + nrm(keys[12], (output_dim,), 0.1),
      "bn2_b": nrm(keys[12], (output_dim,), 0.1),
      "bn2_m": nrm(keys[13], (output_dim,), 0.1),
      "bn2_v": 0.5 + jax.random.uniform(keys[13], (output_dim,)),
      "bn3_g": 1.0 + nrm(keys[14], (c4,), 0.1),
      "bn3_b": nrm(keys[14], (c4,), 0.1),
      "bn3_m": nrm(keys[15], (c4,), 0.1),
      "bn3_v": 0.5 + jax.random.uniform(keys[15], (c4,)),
  }


# ---------------------------------------------------------------------------
# Main
# ---------------------------------------------------------------------------
if __name__ == "__main__":
  key = jax.random.PRNGKey(0)
  k_x, k_p = jax.random.split(key)

  N, Cin, H, W = 2, 4, 16, 16     # input is NCHW, like PyTorch
  output_dim = 4                  # expansion=4 -> 16 output channels

  x = jax.random.normal(k_x, (N, Cin, H, W), jnp.float32)
  params = init_params(k_p, Cin, output_dim)

  # bf16 activations/weights (f32 accumulation) -> relaxed tolerance vs f32 ref
  RTOL, ATOL = 5e-2, 5e-2

  # Case 1: first block of a stage (stride=1, projection on the identity path)
  out1 = bottleneck_forward(x, params, stride=1, is_conv2_0=True)
  jax.block_until_ready(out1)
  ref1 = bottleneck_ref(x, params, stride=1, is_conv2_0=True)
  np.testing.assert_allclose(np.asarray(out1), np.asarray(ref1),
                             rtol=RTOL, atol=ATOL)

  # Case 2: strided block (stride=2, downsampling conv on the identity path)
  out2 = bottleneck_forward(x, params, stride=2, is_conv2_0=False)
  jax.block_until_ready(out2)
  ref2 = bottleneck_ref(x, params, stride=2, is_conv2_0=False)
  np.testing.assert_allclose(np.asarray(out2), np.asarray(ref2),
                             rtol=RTOL, atol=ATOL)

  assert out1.shape == (N, 4 * output_dim, H, W)
  assert out2.shape == (N, 4 * output_dim, H // 2, W // 2)
  print("KERNEL_OK")
</pallas_src>

<mosaic_0001>
module attributes {stable_mosaic.version = 11 : i64} {
  func.func @_pw1_halo_kernel(%arg0: i32, %arg1: memref<1x16x16x4xbf16, #tpu.memory_space<vmem>>, %arg2: memref<4x128xbf16, #tpu.memory_space<vmem>>, %arg3: memref<1x128xf32, #tpu.memory_space<vmem>>, %arg4: memref<1x128xf32, #tpu.memory_space<vmem>>, %arg5: memref<1x18x18x128xbf16, #tpu.memory_space<vmem>>) attributes {dimension_semantics = [#tpu.dimension_semantics<parallel>], iteration_bounds = array<i64: 2>, scalar_prefetch = 0 : i64, scratch_operands = 0 : i64, tpu.core_type = #tpu.core_type<tc>, window_params = [{transform_indices = @transform_0, window_bounds = array<i64: 1, 16, 16, 4>}, {pipeline_mode = #tpu.pipeline_mode<synchronous>, transform_indices = @transform_1, window_bounds = array<i64: 4, 128>}, {pipeline_mode = #tpu.pipeline_mode<synchronous>, transform_indices = @transform_2, window_bounds = array<i64: 1, 128>}, {pipeline_mode = #tpu.pipeline_mode<synchronous>, transform_indices = @transform_3, window_bounds = array<i64: 1, 128>}, {transform_indices = @transform_4, window_bounds = array<i64: 1, 18, 18, 128>}]} {
    %c0 = arith.constant 0 : index
    %c0_0 = arith.constant 0 : index
    %c0_1 = arith.constant 0 : index
    %c0_2 = arith.constant 0 : index
    %0 = vector.load %arg1[%c0, %c0_0, %c0_1, %c0_2] : memref<1x16x16x4xbf16, #tpu.memory_space<vmem>>, vector<1x16x16x4xbf16>
    %1 = vector.shape_cast %0 : vector<1x16x16x4xbf16> to vector<16x16x4xbf16>
    %2 = vector.shape_cast %1 : vector<16x16x4xbf16> to vector<256x4xbf16>
    %c0_3 = arith.constant 0 : index
    %c0_4 = arith.constant 0 : index
    %3 = vector.load %arg2[%c0_3, %c0_4] : memref<4x128xbf16, #tpu.memory_space<vmem>>, vector<4x128xbf16>
    %cst = arith.constant dense<0.000000e+00> : vector<256x128xf32>
    %4 = tpu.matmul %2, %3, %cst {dimension_numbers = #tpu.dot_dimension_numbers<[1], [0], [0], [1], [0, 0, 1, 1], [], []>} : vector<256x4xbf16>, vector<4x128xbf16>, vector<256x128xf32> -> vector<256x128xf32>
    %c0_5 = arith.constant 0 : index
    %c0_6 = arith.constant 0 : index
    %5 = vector.load %arg3[%c0_5, %c0_6] : memref<1x128xf32, #tpu.memory_space<vmem>>, vector<1x128xf32>
    %6 = vector.broadcast %5 : vector<1x128xf32> to vector<256x128xf32>
    %7 = arith.mulf %4, %6 : vector<256x128xf32>
    %c0_7 = arith.constant 0 : index
    %c0_8 = arith.constant 0 : index
    %8 = vector.load %arg4[%c0_7, %c0_8] : memref<1x128xf32, #tpu.memory_space<vmem>>, vector<1x128xf32>
    %9 = vector.broadcast %8 : vector<1x128xf32> to vector<256x128xf32>
    %10 = arith.addf %7, %9 : vector<256x128xf32>
    %cst_9 = arith.constant 0.000000e+00 : f32
    %11 = vector.broadcast %cst_9 : f32 to vector<256x128xf32>
    %12 = arith.maximumf %10, %11 : vector<256x128xf32>
    %cst_10 = arith.constant 0.000000e+00 : bf16
    %13 = vector.broadcast %cst_10 : bf16 to vector<1x18x18x128xbf16>
    %c0_11 = arith.constant 0 : index
    %c0_12 = arith.constant 0 : index
    %c0_13 = arith.constant 0 : index
    %c0_14 = arith.constant 0 : index
    %14 = vector.load %arg5[%c0_11, %c0_12, %c0_13, %c0_14] : memref<1x18x18x128xbf16, #tpu.memory_space<vmem>>, vector<1x18x18x128xbf16>
    tpu.vector_store %arg5[%c0_11, %c0_12, %c0_13, %c0_14], %13 {strides = array<i32>} : memref<1x18x18x128xbf16, #tpu.memory_space<vmem>>, vector<1x18x18x128xbf16>,
    %15 = vector.shape_cast %12 : vector<256x128xf32> to vector<16x16x128xf32>
    %16 = arith.truncf %15 : vector<16x16x128xf32> to vector<16x16x128xbf16>
    %c0_15 = arith.constant 0 : index
    %c1 = arith.constant 1 : index
    %c1_16 = arith.constant 1 : index
    %c0_17 = arith.constant 0 : index
    %17 = vector.load %arg5[%c0_15, %c1, %c1_16, %c0_17] : memref<1x18x18x128xbf16, #tpu.memory_space<vmem>>, vector<1x16x16x128xbf16>
    %18 = vector.shape_cast %17 : vector<1x16x16x128xbf16> to vector<16x16x128xbf16>
    %19 = vector.shape_cast %16 : vector<16x16x128xbf16> to vector<1x16x16x128xbf16>
    tpu.vector_store %arg5[%c0_15, %c1, %c1_16, %c0_17], %19 {strides = array<i32>} : memref<1x18x18x128xbf16, #tpu.memory_space<vmem>>, vector<1x16x16x128xbf16>,
    return
  }
  func.func @transform_0(%arg0: i32) -> (i32, i32, i32, i32) {
    %c0_i32 = arith.constant 0 : i32
    %c0_i32_0 = arith.constant 0 : i32
    %c0_i32_1 = arith.constant 0 : i32
    %c0_i32_2 = arith.constant 0 : i32
    return %arg0, %c0_i32, %c0_i32_0, %c0_i32_1 : i32, i32, i32, i32
  }
  func.func @transform_1(%arg0: i32) -> (i32, i32) {
    %c0_i32 = arith.constant 0 : i32
    %c0_i32_0 = arith.constant 0 : i32
    %c0_i32_1 = arith.constant 0 : i32
    return %c0_i32, %c0_i32_0 : i32, i32
  }
  func.func @transform_2(%arg0: i32) -> (i32, i32) {
    %c0_i32 = arith.constant 0 : i32
    %c0_i32_0 = arith.constant 0 : i32
    %c0_i32_1 = arith.constant 0 : i32
    return %c0_i32, %c0_i32_0 : i32, i32
  }
  func.func @transform_3(%arg0: i32) -> (i32, i32) {
    %c0_i32 = arith.constant 0 : i32
    %c0_i32_0 = arith.constant 0 : i32
    %c0_i32_1 = arith.constant 0 : i32
    return %c0_i32, %c0_i32_0 : i32, i32
  }
  func.func @transform_4(%arg0: i32) -> (i32, i32, i32, i32) {
    %c0_i32 = arith.constant 0 : i32
    %c0_i32_0 = arith.constant 0 : i32
    %c0_i32_1 = arith.constant 0 : i32
    %c0_i32_2 = arith.constant 0 : i32
    return %arg0, %c0_i32, %c0_i32_0, %c0_i32_1 : i32, i32, i32, i32
  }
}

</mosaic_0001>

<bundles_post_ra>
// kernel: tpu_custom_call.1
= control target key start
LH: loop header
LB: loop body
LE: loop exit
PB: predicated region body
PF: predicated region fallthrough
CT: control target
= control target key end

     0   :  { %s1586_s15 = smov 0   ;;  %s2082_s0 = inlined_call_operand.vmem [shape: bf16[2,16,16,4], index: 0, kind: input, shape index: {}]   ;;  %s2083_s1 = inlined_call_operand.vmem [shape: bf16[4,128], index: 1, kind: input, shape index: {}]   ;;  %s2084_s2 = inlined_call_operand.vmem [shape: f32[1,128], index: 2, kind: input, shape index: {}]   ;;  %s2085_s3 = inlined_call_operand.vmem [shape: f32[1,128], index: 3, kind: input, shape index: {}]   ;;  %s2086_s4 = inlined_call_operand.vmem [shape: bf16[2,18,18,128], index: 4, kind: output, shape index: {}]  }
   0x1 LB: > { %s1282_s16 = sadd.s32 4294967295, %s1558_s15   ;;  %p1286_p0 = scmp.ge.s32.totalorder %s1558_s15, 1  ;;  %s1558_s15 = sphi %s1586_s15, %s14_s15  }
   0x2   : > { %p162_p1 = scmp.lt.s32.totalorder %s1558_s15, 3 }
   0x4   : > { %p163_p2 = pnand %p1286_p0, %p162_p1 }
   0x5   : > { %v231_v0 = vld [vmem:[%s2083_s1] sm:$0x3] (!%p163_p2)  ;;  %vm361_vm0 = vcmask (!%p163_p2), 1041408   ;;  %p188_p3 = scmp.lt.s32.totalorder (!%p163_p2), %s1282_s16, 1  ;;  %vm312_vm1 = vcmask (!%p163_p2), 31744   ;;  %v1560_v18 = vmov (!%p163_p2), 0  }
   0x6   : > { %166 = sbr.rel (%p163_p2) target bundleno = 325 (0x145), region = 36  ;;  %1524 = vmatprep.subr.msk.bf16.mxu0 (!%p163_p2), %vm361_vm0, %v231_v0  ;;  %1525 = vmatprep.subr.msk.bf16.mxu1 (!%p163_p2), %vm361_vm0, %v231_v0  ;;  %v363_v1 = vsel (!%p163_p2), %vm361_vm0, %v231_v0, 0  ;;  %v1700_v19 = vld [vmem:[%s2084_s2] ss:$0 sm:$0xff] (!%p163_p2)  ;;  %vm1110_vm2 = vcmask (!%p163_p2), 1043456   ;;  %vm1117_vm6 = vcmask (!%p163_p2), 1040384  }
   0x7   : > { %1489 = vmatpush3.bf16.msra.mxu0 (!%p163_p2), %v363_v1  ;;  %1523 = vmatpush3.bf16.msra.mxu1 (!%p163_p2), %v363_v1  ;;  %v1705_v21 = vld [vmem:[%s2085_s3] ss:$0 sm:$0xff] (!%p163_p2)  ;;  %vm1111_vm3 = vsmask.f32 (!%p163_p2), 7938  ;;  %vm786_vm4 = vsmask.f32 (!%p163_p2), 256 }
   0x8   : > { %vm787_vm5 = vsmask.f32 (!%p163_p2), 4368  ;;  %vm1745_vm7 = vmand (!%p163_p2), %vm1110_vm2, %vm1111_vm3 }
   0x9   : > { %vm1766_vm8 = vmor (!%p163_p2), %vm786_vm4, %vm787_vm5 }
   0xa   : > { %vm1776_vm9 = vmand (!%p163_p2), %vm1117_vm6, %vm786_vm4 }
   0xd   : > { %s2094_s16 = smov (!%p188_p3, %s1282_s16), 1 }
   0xe   : > { %s1438_s19 = sshll.u32 %s2094_s16, 7  ;;  %s1526_s23 = smul.u32 216, %s2094_s16 }
   0xf   : > { %s1603_s22 = scalar_lea.vmem %s2082_s0, %s1438_s19 }
  0x10   : > { %v1536_v2 = vld [vmem:[%s1603_s22] sm:$0xff]   ;;  %v1538_v4 = vld [vmem:[%s1603_s22 + $0x8] sm:$0xff]   ;;  %v1540_v6 = vld [vmem:[%s1603_s22 + $0x10] sm:$0xff]   ;;  %s1641_s26 = scalar_lea.vmem %s2086_s4, %s1526_s23 }
  0x11   : > { %v1537_v3 = vld [vmem:[%s1603_s22 + $0x40] sm:$0xff]   ;;  %1490 = vmatprep.mubr.msk.bf16.mxu0 %vm312_vm1, %v1536_v2  ;;  %v1539_v5 = vld [vmem:[%s1603_s22 + $0x48] sm:$0xff]   ;;  %v1541_v7 = vld [vmem:[%s1603_s22 + $0x50] sm:$0xff]   ;;  %642 = vst [vmem:[%s1641_s26 + $0x18] sm:$0xf] %v1560_v18 }
  0x12   : > { %1506 = vmatprep.mubr.msk.bf16.mxu1 %vm312_vm1, %v1537_v3  ;;  %1491 = vmatmul.mubr.msk.bf16.vlgmr.msra.gmra.mrb[0].mxu0 %vm312_vm1, %v1538_v4  ;;  %v1542_v8 = vld [vmem:[%s1603_s22 + $0x18] sm:$0xff]   ;;  %v1544_v10 = vld [vmem:[%s1603_s22 + $0x20] sm:$0xff]   ;;  %v1546_v12 = vld [vmem:[%s1603_s22 + $0x28] sm:$0xff]   ;;  %636 = vst [vmem:[%s1641_s26] sm:$0xf] %v1560_v18 }
  0x13   : > { %1507 = vmatmul.mubr.msk.bf16.vlgmr.msra.gmra.mrb[0].mxu1 %vm312_vm1, %v1539_v5  ;;  %1494 = vmatprep.mubr.msk.bf16.mxu0 %vm312_vm1, %v1540_v6  ;;  %v1543_v9 = vld [vmem:[%s1603_s22 + $0x58] sm:$0xff]   ;;  %v1545_v11 = vld [vmem:[%s1603_s22 + $0x60] sm:$0xff]   ;;  %v1547_v13 = vld [vmem:[%s1603_s22 + $0x68] sm:$0xff]   ;;  %637 = vst [vmem:[%s1641_s26 + $0x4] sm:$0xf] %v1560_v18 }
  0x14   : > { %1510 = vmatprep.mubr.msk.bf16.mxu1 %vm312_vm1, %v1541_v7  ;;  %v1548_v14 = vld [vmem:[%s1603_s22 + $0x30] sm:$0xff]   ;;  %v1550_v16 = vld [vmem:[%s1603_s22 + $0x38] sm:$0xff]   ;;  %638 = vst [vmem:[%s1641_s26 + $0x8] sm:$0x1] %v1560_v18  ;;  %639 = vst [vmem:[%s1641_s26 + $0xc] sm:$0xf] %v1560_v18 }
  0x15   : > { %v1549_v15 = vld [vmem:[%s1603_s22 + $0x70] sm:$0xff]   ;;  %v1551_v17 = vld [vmem:[%s1603_s22 + $0x78] sm:$0xff]   ;;  %640 = vst [vmem:[%s1641_s26 + $0x10] sm:$0xf] %v1560_v18  ;;  %641 = vst [vmem:[%s1641_s26 + $0x14] sm:$0x1] %v1560_v18 }
  0x16   : > { %643 = vst [vmem:[%s1641_s26 + $0x1c] sm:$0xf] %v1560_v18  ;;  %644 = vst [vmem:[%s1641_s26 + $0x20] sm:$0x1] %v1560_v18 }
  0x17   : > { %645 = vst [vmem:[%s1641_s26 + $0x24] sm:$0xf] %v1560_v18  ;;  %646 = vst [vmem:[%s1641_s26 + $0x28] sm:$0xf] %v1560_v18 }
  0x18   : > { %647 = vst [vmem:[%s1641_s26 + $0x2c] sm:$0x1] %v1560_v18  ;;  %648 = vst [vmem:[%s1641_s26 + $0x30] sm:$0xf] %v1560_v18  ;;  %v1361_v62 = vld [vmem:[%s1641_s26 + $0x18] sm:$0xf] }
  0x19   : > { %649 = vst [vmem:[%s1641_s26 + $0x34] sm:$0xf] %v1560_v18  ;;  %650 = vst [vmem:[%s1641_s26 + $0x38] sm:$0x1] %v1560_v18 }
  0x1a   : > { %1495 = vmatmul.mubr.msk.bf16.gmra.mrb[4].mxu0 %vm312_vm1, %v1542_v8  ;;  %651 = vst [vmem:[%s1641_s26 + $0x3c] sm:$0xf] %v1560_v18  ;;  %652 = vst [vmem:[%s1641_s26 + $0x40] sm:$0xf] %v1560_v18 }
  0x1b   : > { %1511 = vmatmul.mubr.msk.bf16.gmra.mrb[4].mxu1 %vm312_vm1, %v1543_v9  ;;  %1498 = vmatprep.mubr.msk.bf16.mxu0 %vm312_vm1, %v1544_v10  ;;  %653 = vst [vmem:[%s1641_s26 + $0x44] sm:$0x1] %v1560_v18  ;;  %654 = vst [vmem:[%s1641_s26 + $0x48] sm:$0xf] %v1560_v18 }
  0x1c   : > { %1514 = vmatprep.mubr.msk.bf16.mxu1 %vm312_vm1, %v1545_v11  ;;  %655 = vst [vmem:[%s1641_s26 + $0x4c] sm:$0xf] %v1560_v18  ;;  %656 = vst [vmem:[%s1641_s26 + $0x50] sm:$0x1] %v1560_v18 }
  0x1d   : > { %657 = vst [vmem:[%s1641_s26 + $0x54] sm:$0xf] %v1560_v18  ;;  %658 = vst [vmem:[%s1641_s26 + $0x58] sm:$0xf] %v1560_v18 }
  0x1e   : > { %659 = vst [vmem:[%s1641_s26 + $0x5c] sm:$0x1] %v1560_v18  ;;  %660 = vst [vmem:[%s1641_s26 + $0x60] sm:$0xf] %v1560_v18 }
  0x1f   : > { %661 = vst [vmem:[%s1641_s26 + $0x64] sm:$0xf] %v1560_v18  ;;  %662 = vst [vmem:[%s1641_s26 + $0x68] sm:$0x1] %v1560_v18 }
  0x20   : > { %663 = vst [vmem:[%s1641_s26 + $0x6c] sm:$0xf] %v1560_v18  ;;  %664 = vst [vmem:[%s1641_s26 + $0x70] sm:$0xf] %v1560_v18 }
  0x21   : > { %665 = vst [vmem:[%s1641_s26 + $0x74] sm:$0x1] %v1560_v18  ;;  %666 = vst [vmem:[%s1641_s26 + $0x78] sm:$0xf] %v1560_v18 }
  0x22   : > { %1499 = vmatmul.mubr.msk.bf16.gmra.mrb[8].mxu0 %vm312_vm1, %v1546_v12  ;;  %667 = vst [vmem:[%s1641_s26 + $0x7c] sm:$0xf] %v1560_v18  ;;  %668 = vst [vmem:[%s1641_s26 + $0x80] sm:$0x1] %v1560_v18 }
  0x23   : > { %1515 = vmatmul.mubr.msk.bf16.gmra.mrb[8].mxu1 %vm312_vm1, %v1547_v13  ;;  %1502 = vmatprep.mubr.msk.bf16.mxu0 %vm312_vm1, %v1548_v14  ;;  %669 = vst [vmem:[%s1641_s26 + $0x84] sm:$0xf] %v1560_v18  ;;  %670 = vst [vmem:[%s1641_s26 + $0x88] sm:$0xf] %v1560_v18 }
  0x24   : > { %1518 = vmatprep.mubr.msk.bf16.mxu1 %vm312_vm1, %v1549_v15  ;;  %671 = vst [vmem:[%s1641_s26 + $0x8c] sm:$0x1] %v1560_v18  ;;  %672 = vst [vmem:[%s1641_s26 + $0x90] sm:$0xf] %v1560_v18 }
  0x25   : > { %673 = vst [vmem:[%s1641_s26 + $0x94] sm:$0xf] %v1560_v18  ;;  %674 = vst [vmem:[%s1641_s26 + $0x98] sm:$0x1] %v1560_v18 }
  0x26   : > { %675 = vst [vmem:[%s1641_s26 + $0x9c] sm:$0xf] %v1560_v18  ;;  %676 = vst [vmem:[%s1641_s26 + $0xa0] sm:$0xf] %v1560_v18 }
  0x27   : > { %677 = vst [vmem:[%s1641_s26 + $0xa4] sm:$0x1] %v1560_v18  ;;  %678 = vst [vmem:[%s1641_s26 + $0xa8] sm:$0xf] %v1560_v18 }
  0x28   : > { %679 = vst [vmem:[%s1641_s26 + $0xac] sm:$0xf] %v1560_v18  ;;  %680 = vst [vmem:[%s1641_s26 + $0xb0] sm:$0x1] %v1560_v18  ;;  %v1401_v13 = vld [vmem:[%s1641_s26 + $0x78] sm:$0xf] }
  0x29   : > { %681 = vst [vmem:[%s1641_s26 + $0xb4] sm:$0xf] %v1560_v18  ;;  %682 = vst [vmem:[%s1641_s26 + $0xb8] sm:$0xf] %v1560_v18 }
  0x2a   : > { %1503 = vmatmul.mubr.msk.bf16.gmra.mrb[12].mxu0 %vm312_vm1, %v1550_v16  ;;  %683 = vst [vmem:[%s1641_s26 + $0xbc] sm:$0x1] %v1560_v18  ;;  %684 = vst [vmem:[%s1641_s26 + $0xc0] sm:$0xf] %v1560_v18 }
  0x2b   : > { %1519 = vmatmul.mubr.msk.bf16.gmra.mrb[12].mxu1 %vm312_vm1, %v1551_v17  ;;  %685 = vst [vmem:[%s1641_s26 + $0xc4] sm:$0xf] %v1560_v18  ;;  %686 = vst [vmem:[%s1641_s26 + $0xc8] sm:$0x1] %v1560_v18 }
  0x2c   : > { %687 = vst [vmem:[%s1641_s26 + $0xcc] sm:$0xf] %v1560_v18  ;;  %688 = vst [vmem:[%s1641_s26 + $0xd0] sm:$0xf] %v1560_v18 }
  0x2d   : > { %689 = vst [vmem:[%s1641_s26 + $0xd4] sm:$0x1] %v1560_v18 }
  0xe5   : > { %v1492_v20 = vpop.f32.mrb[0].mxu0 }
  0xe6   : > { %v535_v22 = vmul.f32 %v1492_v20, %v1700_v19  ;;  %v1508_v23 = vpop.f32.mrb[0].mxu1  ;;  %v399_v24 = vpop.f32.mrb[1].mxu0 }
  0xe7   : > { %v551_v25 = vmul.f32 %v1508_v23, %v1700_v19  ;;  %v533_v26 = vmul.f32 %v1700_v19, %v399_v24  ;;  %v463_v27 = vpop.f32.mrb[1].mxu1  ;;  %v1493_v28 = vpop.f32.mrb[2].mxu0 }
  0xe8   : > { %v574_v29 = vadd.f32 %v1705_v21, %v535_v22  ;;  %v549_v30 = vmul.f32 %v1700_v19, %v463_v27  ;;  %v536_v31 = vmul.f32 %v1493_v28, %v1700_v19  ;;  %v1509_v32 = vpop.f32.mrb[2].mxu1  ;;  %v402_v33 = vpop.f32.mrb[3].mxu0  ;;  %v1356_v22 = vld [vmem:[%s1641_s26 + $0xc] sm:$0xf] }
  0xe9   : > { %v590_v34 = vadd.f32 %v1705_v21, %v551_v25  ;;  %v572_v35 = vadd.f32 %v1705_v21, %v533_v26  ;;  %v552_v36 = vmul.f32 %v1509_v32, %v1700_v19  ;;  %v534_v37 = vmul.f32 %v1700_v19, %v402_v33  ;;  %v466_v38 = vpop.f32.mrb[3].mxu1 }
  0xea   : > { %v606_v39 = vmax.f32 %v574_v29, 0.0  ;;  %v588_v40 = vadd.f32 %v1705_v21, %v549_v30  ;;  %v575_v41 = vadd.f32 %v1705_v21, %v536_v31  ;;  %v550_v42 = vmul.f32 %v1700_v19, %v466_v38  ;;  %v1396_v29 = vld [vmem:[%s1641_s26 + $0x6c] sm:$0xf] }
  0xeb   : > { %v622_v43 = vmax.f32 %v590_v34, 0.0  ;;  %v604_v44 = vmax.f32 %v572_v35, 0.0  ;;  %v591_v45 = vadd.f32 %v1705_v21, %v552_v36  ;;  %v1722_v46 = vadd.f32 %v1705_v21, %v534_v37  ;;  %v1364_v36 = vld [vmem:[%s1641_s26 + $0x20] sm:$0x1] }
  0xec   : > { %v1441_v47 = vpack.c.bf16 %v606_v39, %v606_v39  ;;  %v620_v48 = vmax.f32 %v588_v40, 0.0  ;;  %v607_v49 = vmax.f32 %v575_v41, 0.0  ;;  %v1725_v50 = vadd.f32 %v1705_v21, %v550_v42 }
  0xed   : > { %v1457_v51 = vpack.c.bf16 %v622_v43, %v622_v43  ;;  %v1439_v52 = vpack.c.bf16 %v604_v44, %v604_v44  ;;  %v623_v53 = vmax.f32 %v591_v45, 0.0  ;;  %v605_v54 = vmax.f32 %v1722_v46, 0.0  ;;  %v1728_v55 = vpop.f32.mrb[4].mxu0 }
  0xee   : > { %v807_v56 = vshrl.u32 %v1441_v47, 16  ;;  %v810_v57 = vshll.u32 %v1441_v47, 16  ;;  %v1455_v58 = vpack.c.bf16 %v620_v48, %v620_v48  ;;  %v1442_v59 = vpack.c.bf16 %v607_v49, %v607_v49  ;;  %v1730_v60 = vpop.f32.mrb[4].mxu1  ;;  %v1732_v61 = vpop.f32.mrb[5].mxu0 }
  0xef   : > { %v943_v63 = vshrl.u32 %v1457_v51, 16  ;;  %v946_v0 = vshll.u32 %v1457_v51, 16  ;;  %v790_v1 = vshrl.u32 %v1439_v52, 16  ;;  %v793_v2 = vshll.u32 %v1439_v52, 16  ;;  %v1735_v3 = vpop.f32.mrb[5].mxu1  ;;  %v1737_v4 = vpop.f32.mrb[6].mxu0 }
  0xf0   : > { %v809_v5 = vrot.slane %v807_v56, 7  ;;  %v926_v6 = vshrl.u32 %v1455_v58, 16  ;;  %v929_v7 = vshll.u32 %v1455_v58, 16  ;;  %v815_v8 = vshrl.u32 %v1442_v59, 16  ;;  %v1739_v9 = vpop.f32.mrb[6].mxu1  ;;  %v1741_v10 = vpop.f32.mrb[7].mxu0 }
  0xf1   : > { %v1749_v12 = vrot.slane %v943_v63, 7  ;;  %v1752_v14 = vrot.slane %v790_v1, 7  ;;  %v818_v15 = vshll.u32 %v1442_v59, 16  ;;  %v1458_v16 = vpack.c.bf16 %v623_v53, %v623_v53  ;;  %v1754_v17 = vpop.f32.mrb[7].mxu1 }
  0xf2   : > { %v812_v18 = vor.u32 %v810_v57, %v809_v5  ;;  %v813_v20 = vrot.slane %v809_v5, 4  ;;  %v1757_v23 = vrot.slane %v926_v6, 7  ;;  %v817_v24 = vrot.slane %v815_v8, 7 }
  0xf3   : > { %v948_v25 = vor.u32 %v946_v0, %v1749_v12  ;;  %v949_v26 = vrot.slane %v1749_v12, 4  ;;  %v795_v27 = vor.u32 %v793_v2, %v1752_v14  ;;  %v796_v28 = vrot.slane %v1752_v14, 4 }
  0xf4   : > { %v1123_v31 = vsel %vm1745_vm7, %v812_v18, %v1361_v62  ;;  %v931_v32 = vor.u32 %v929_v7, %v1757_v23  ;;  %v932_v33 = vrot.slane %v1757_v23, 4  ;;  %v820_v34 = vor.u32 %v818_v15, %v817_v24 }
  0xf5   : > { %1362 = vst [vmem:[%s1641_s26 + $0x18] sm:$0xf] %v1123_v31  ;;  %v1179_v37 = vsel %vm1745_vm7, %v948_v25, %v1401_v13  ;;  %v1114_v38 = vsel %vm1745_vm7, %v795_v27, %v1356_v22  ;;  %v822_v39 = vrot.slane %v817_v24, 4  ;;  %v951_v40 = vshrl.u32 %v1458_v16, 16  ;;  %v1786_v41 = vpop.f32.mrb[8].mxu0 }
  0xf6   : > { %1402 = vst [vmem:[%s1641_s26 + $0x78] sm:$0xf] %v1179_v37  ;;  %1357 = vst [vmem:[%s1641_s26 + $0xc] sm:$0xf] %v1114_v38  ;;  %v1172_v42 = vsel %vm1745_vm7, %v931_v32, %v1396_v29  ;;  %v821_v43 = vsel %vm1766_vm8, %v813_v20, %v820_v34  ;;  %v954_v44 = vshll.u32 %v1458_v16, 16  ;;  %v1440_v45 = vpack.c.bf16 %v605_v54, %v605_v54  ;;  %v1794_v46 = vpop.f32.mrb[8].mxu1 }
  0xf7   : > { %v1796_v47 = vpop.f32.mrb[9].mxu0  ;;  %1397 = vst [vmem:[%s1641_s26 + $0x6c] sm:$0xf] %v1172_v42  ;;  %1363 = vst [vmem:[%s1641_s26 + $0x1c] sm:$0xf] %v821_v43  ;;  %v1127_v48 = vsel %vm1776_vm9, %v822_v39, %v1364_v36  ;;  %v953_v49 = vrot.slane %v951_v40, 7  ;;  %v539_v52 = vmul.f32 %v1728_v55, %v1700_v19  ;;  %v555_v59 = vmul.f32 %v1730_v60, %v1700_v19 }
  0xf8   : > { %v621_v51 = vmax.f32 %v1725_v50, 0.0  ;;  %v1805_v53 = vpop.f32.mrb[9].mxu1  ;;  %v1807_v56 = vpop.f32.mrb[10].mxu0  ;;  %1365 = vst [vmem:[%s1641_s26 + $0x20] sm:$0x1] %v1127_v48  ;;  %v798_v57 = vshrl.u32 %v1440_v45, 16  ;;  %v537_v62 = vmul.f32 %v1700_v19, %v1732_v61  ;;  %v553_v61 = vmul.f32 %v1700_v19, %v1735_v3 }
  0xf9   : > { %v1404_v54 = vld [vmem:[%s1641_s26 + $0x80] sm:$0x1]  ;;  %v801_v58 = vshll.u32 %v1440_v45, 16  ;;  %v1815_v63 = vpop.f32.mrb[10].mxu1  ;;  %v1817_v50 = vpop.f32.mrb[11].mxu0  ;;  %v956_v55 = vor.u32 %v954_v44, %v953_v49  ;;  %v958_v0 = vrot.slane %v953_v49, 4  ;;  %v578_v2 = vadd.f32 %v1705_v21, %v539_v52 }
  0xfa   : > { %v1456_v1 = vpack.c.bf16 %v621_v51, %v621_v51  ;;  %v1820_v5 = vpop.f32.mrb[11].mxu1  ;;  %v800_v6 = vrot.slane %v798_v57, 7  ;;  %v594_v7 = vadd.f32 %v1705_v21, %v555_v59  ;;  %v576_v60 = vadd.f32 %v1705_v21, %v537_v62  ;;  %v1359_v13 = vld [vmem:[%s1641_s26 + $0x14] sm:$0x1] }
  0xfb   : > { %v957_v8 = vsel %vm1766_vm8, %v949_v26, %v956_v55  ;;  %v1183_v12 = vsel %vm1776_vm9, %v958_v0, %v1404_v54  ;;  %v610_v22 = vmax.f32 %v578_v2, 0.0  ;;  %v592_v27 = vadd.f32 %v1705_v21, %v553_v61  ;;  %v1399_v34 = vld [vmem:[%s1641_s26 + $0x74] sm:$0x1]  ;;  %v1371_v2 = vld [vmem:[%s1641_s26 + $0x30] sm:$0xf] }
  0xfc   : > { %v934_v15 = vshrl.u32 %v1456_v1, 16  ;;  %v937_v16 = vshll.u32 %v1456_v1, 16  ;;  %1403 = vst [vmem:[%s1641_s26 + $0x7c] sm:$0xf] %v957_v8  ;;  %1405 = vst [vmem:[%s1641_s26 + $0x80] sm:$0x1] %v1183_v12  ;;  %v803_v18 = vor.u32 %v801_v58, %v800_v6  ;;  %v540_v26 = vmul.f32 %v1737_v4, %v1700_v19 }
  0xfd   : > { %v805_v20 = vrot.slane %v800_v6, 4  ;;  %v626_v24 = vmax.f32 %v594_v7, 0.0  ;;  %v608_v3 = vmax.f32 %v576_v60, 0.0  ;;  %v1836_v29 = vpop.f32.mrb[12].mxu0  ;;  %v1445_v36 = vpack.c.bf16 %v610_v22, %v610_v22  ;;  %v1411_v6 = vld [vmem:[%s1641_s26 + $0x90] sm:$0xf] }
  0xfe   : > { %v936_v25 = vrot.slane %v934_v15, 7  ;;  %v804_v31 = vsel %vm1766_vm8, %v796_v28, %v803_v18  ;;  %v1845_v38 = vpop.f32.mrb[12].mxu1  ;;  %v1847_v39 = vpop.f32.mrb[13].mxu0  ;;  %v624_v14 = vmax.f32 %v592_v27, 0.0  ;;  %v579_v23 = vadd.f32 %v1705_v21, %v540_v26 }
  0xff   : > { %v1120_v32 = vsel %vm1776_vm9, %v805_v20, %v1359_v13  ;;  %v1461_v37 = vpack.c.bf16 %v626_v24, %v626_v24  ;;  %1358 = vst [vmem:[%s1641_s26 + $0x10] sm:$0xf] %v804_v31  ;;  %v1443_v42 = vpack.c.bf16 %v608_v3, %v608_v3  ;;  %v1851_v43 = vpop.f32.mrb[13].mxu1  ;;  %v1853_v28 = vpop.f32.mrb[14].mxu0  ;;  %v841_v44 = vshrl.u32 %v1445_v36, 16 }
 0x100   : > { %1360 = vst [vmem:[%s1641_s26 + $0x14] sm:$0x1] %v1120_v32  ;;  %v939_v4 = vor.u32 %v937_v16, %v936_v25  ;;  %v941_v40 = vrot.slane %v936_v25, 4  ;;  %v844_v45 = vshll.u32 %v1445_v36, 16  ;;  %v1855_v51 = vpop.f32.mrb[14].mxu1  ;;  %v1857_v52 = vpop.f32.mrb[15].mxu0  ;;  %v1459_v1 = vpack.c.bf16 %v624_v14, %v624_v14 }
 0x101   : > { %v977_v48 = vshrl.u32 %v1461_v37, 16  ;;  %v980_v49 = vshll.u32 %v1461_v37, 16  ;;  %v824_v58 = vshrl.u32 %v1443_v42, 16  ;;  %v827_v59 = vshll.u32 %v1443_v42, 16  ;;  %v1865_v62 = vpop.f32.mrb[15].mxu1 }
 0x102   : > { %v940_v54 = vsel %vm1766_vm8, %v932_v33, %v939_v4  ;;  %v1176_v57 = vsel %vm1776_vm9, %v941_v40, %v1399_v34  ;;  %v1869_v55 = vrot.slane %v841_v44, 7  ;;  %v556_v7 = vmul.f32 %v1739_v9, %v1700_v19  ;;  %v1366_v16 = vld [vmem:[%s1641_s26 + $0x24] sm:$0xf] }
 0x103   : > { %1398 = vst [vmem:[%s1641_s26 + $0x70] sm:$0xf] %v940_v54  ;;  %1400 = vst [vmem:[%s1641_s26 + $0x74] sm:$0x1] %v1176_v57  ;;  %v1871_v0 = vrot.slane %v977_v48, 7  ;;  %v1876_v33 = vrot.slane %v824_v58, 7  ;;  %v538_v60 = vmul.f32 %v1700_v19, %v1741_v10  ;;  %v554_v61 = vmul.f32 %v1700_v19, %v1754_v17 }
 0x104   : > { %v846_v8 = vor.u32 %v844_v45, %v1869_v55  ;;  %v847_v12 = vrot.slane %v1869_v55, 4  ;;  %v960_v10 = vshrl.u32 %v1459_v1, 16  ;;  %v963_v20 = vshll.u32 %v1459_v1, 16  ;;  %v1406_v32 = vld [vmem:[%s1641_s26 + $0x84] sm:$0xf] }
 0x105   : > { %v982_v13 = vor.u32 %v980_v49, %v1871_v0  ;;  %v983_v15 = vrot.slane %v1871_v0, 4  ;;  %v829_v9 = vor.u32 %v827_v59, %v1876_v33  ;;  %v830_v18 = vrot.slane %v1876_v33, 4 }
 0x106   : > { %v1137_v17 = vsel %vm1745_vm7, %v846_v8, %v1371_v2  ;;  %v611_v24 = vmax.f32 %v579_v23, 0.0  ;;  %v595_v25 = vadd.f32 %v1705_v21, %v556_v7  ;;  %v962_v27 = vrot.slane %v960_v10, 7  ;;  %v1374_v2 = vld [vmem:[%s1641_s26 + $0x38] sm:$0x1] }
 0x107   : > { %v1193_v22 = vsel %vm1745_vm7, %v982_v13, %v1411_v6  ;;  %1372 = vst [vmem:[%s1641_s26 + $0x30] sm:$0xf] %v1137_v17  ;;  %v1130_v3 = vsel %vm1745_vm7, %v829_v9, %v1366_v16  ;;  %v577_v26 = vadd.f32 %v1705_v21, %v538_v60  ;;  %v593_v31 = vadd.f32 %v1705_v21, %v554_v61  ;;  %v1414_v10 = vld [vmem:[%s1641_s26 + $0x98] sm:$0x1] }
 0x108   : > { %1412 = vst [vmem:[%s1641_s26 + $0x90] sm:$0xf] %v1193_v22  ;;  %1367 = vst [vmem:[%s1641_s26 + $0x24] sm:$0xf] %v1130_v3  ;;  %v1446_v34 = vpack.c.bf16 %v611_v24, %v611_v24  ;;  %v627_v36 = vmax.f32 %v595_v25, 0.0  ;;  %v543_v37 = vmul.f32 %v1786_v41, %v1700_v19  ;;  %v559_v4 = vmul.f32 %v1794_v46, %v1700_v19 }
 0x109   : > { %v965_v40 = vor.u32 %v963_v20, %v962_v27  ;;  %v966_v42 = vrot.slane %v962_v27, 4  ;;  %v609_v14 = vmax.f32 %v577_v26, 0.0  ;;  %v625_v44 = vmax.f32 %v593_v31, 0.0  ;;  %v1369_v31 = vld [vmem:[%s1641_s26 + $0x2c] sm:$0x1] }
 0x10a   : > { %v849_v45 = vshrl.u32 %v1446_v34, 16  ;;  %v852_v48 = vshll.u32 %v1446_v34, 16  ;;  %v1462_v49 = vpack.c.bf16 %v627_v36, %v627_v36  ;;  %v582_v54 = vadd.f32 %v1705_v21, %v543_v37 }
 0x10b   : > { %v1186_v57 = vsel %vm1745_vm7, %v965_v40, %v1406_v32  ;;  %v1444_v58 = vpack.c.bf16 %v609_v14, %v609_v14  ;;  %v1460_v59 = vpack.c.bf16 %v625_v44, %v625_v44  ;;  %v598_v41 = vadd.f32 %v1705_v21, %v559_v4  ;;  %v1409_v32 = vld [vmem:[%s1641_s26 + $0x8c] sm:$0x1] }
 0x10c   : > { %1407 = vst [vmem:[%s1641_s26 + $0x84] sm:$0xf] %v1186_v57  ;;  %v851_v46 = vrot.slane %v849_v45, 7  ;;  %v985_v55 = vshrl.u32 %v1462_v49, 16  ;;  %v988_v1 = vshll.u32 %v1462_v49, 16  ;;  %v614_v23 = vmax.f32 %v582_v54, 0.0 }
 0x10d   : > { %v832_v6 = vshrl.u32 %v1444_v58, 16  ;;  %v835_v7 = vshll.u32 %v1444_v58, 16  ;;  %v968_v60 = vshrl.u32 %v1460_v59, 16  ;;  %v971_v61 = vshll.u32 %v1460_v59, 16  ;;  %v1381_v54 = vld [vmem:[%s1641_s26 + $0x48] sm:$0xf] }
 0x10e   : > { %v854_v8 = vor.u32 %v852_v48, %v851_v46  ;;  %v856_v13 = vrot.slane %v851_v46, 4  ;;  %v987_v16 = vrot.slane %v985_v55, 7  ;;  %v1449_v9 = vpack.c.bf16 %v614_v23, %v614_v23 }
 0x10f   : > { %v834_v20 = vrot.slane %v832_v6, 7  ;;  %v970_v17 = vrot.slane %v968_v60, 7  ;;  %v630_v22 = vmax.f32 %v598_v41, 0.0  ;;  %v541_v24 = vmul.f32 %v1700_v19, %v1796_v47 }
 0x110   : > { %v855_v25 = vsel %vm1766_vm8, %v847_v12, %v854_v8  ;;  %v1141_v3 = vsel %vm1776_vm9, %v856_v13, %v1374_v2  ;;  %v990_v27 = vor.u32 %v988_v1, %v987_v16  ;;  %v992_v26 = vrot.slane %v987_v16, 4 }
 0x111   : > { %1373 = vst [vmem:[%s1641_s26 + $0x34] sm:$0xf] %v855_v25  ;;  %1375 = vst [vmem:[%s1641_s26 + $0x38] sm:$0x1] %v1141_v3  ;;  %v837_v34 = vor.u32 %v835_v7, %v834_v20  ;;  %v839_v36 = vrot.slane %v834_v20, 4  ;;  %v973_v47 = vor.u32 %v971_v61, %v970_v17  ;;  %v975_v37 = vrot.slane %v970_v17, 4 }
 0x112   : > { %v991_v12 = vsel %vm1766_vm8, %v983_v15, %v990_v27  ;;  %v1197_v4 = vsel %vm1776_vm9, %v992_v26, %v1414_v10  ;;  %v875_v40 = vshrl.u32 %v1449_v9, 16  ;;  %v878_v14 = vshll.u32 %v1449_v9, 16  ;;  %v1421_v7 = vld [vmem:[%s1641_s26 + $0xa8] sm:$0xf] }
 0x113   : > { %1413 = vst [vmem:[%s1641_s26 + $0x94] sm:$0xf] %v991_v12  ;;  %1415 = vst [vmem:[%s1641_s26 + $0x98] sm:$0x1] %v1197_v4  ;;  %v838_v44 = vsel %vm1766_vm8, %v830_v18, %v837_v34  ;;  %v1134_v45 = vsel %vm1776_vm9, %v839_v36, %v1369_v31  ;;  %v974_v0 = vsel %vm1766_vm8, %v966_v42, %v973_v47 }
 0x114   : > { %v1190_v15 = vsel %vm1776_vm9, %v975_v37, %v1409_v32  ;;  %1368 = vst [vmem:[%s1641_s26 + $0x28] sm:$0xf] %v838_v44  ;;  %1370 = vst [vmem:[%s1641_s26 + $0x2c] sm:$0x1] %v1134_v45  ;;  %v1947_v48 = vrot.slane %v875_v40, 7  ;;  %v1465_v49 = vpack.c.bf16 %v630_v22, %v630_v22  ;;  %v580_v33 = vadd.f32 %v1705_v21, %v541_v24 }
 0x115   : > { %1408 = vst [vmem:[%s1641_s26 + $0x88] sm:$0xf] %v974_v0  ;;  %1410 = vst [vmem:[%s1641_s26 + $0x8c] sm:$0x1] %v1190_v15  ;;  %v557_v18 = vmul.f32 %v1700_v19, %v1805_v53  ;;  %v544_v57 = vmul.f32 %v1807_v56, %v1700_v19  ;;  %v560_v42 = vmul.f32 %v1815_v63, %v1700_v19  ;;  %v1376_v37 = vld [vmem:[%s1641_s26 + $0x3c] sm:$0xf] }
 0x116   : > { %v542_v58 = vmul.f32 %v1700_v19, %v1817_v50  ;;  %v558_v59 = vmul.f32 %v1700_v19, %v1820_v5  ;;  %v880_v41 = vor.u32 %v878_v14, %v1947_v48  ;;  %v881_v46 = vrot.slane %v1947_v48, 4  ;;  %v1416_v48 = vld [vmem:[%s1641_s26 + $0x9c] sm:$0xf] }
 0x117   : > { %v1011_v53 = vshrl.u32 %v1465_v49, 16  ;;  %v1014_v55 = vshll.u32 %v1465_v49, 16  ;;  %v612_v1 = vmax.f32 %v580_v33, 0.0  ;;  %v596_v56 = vadd.f32 %v1705_v21, %v557_v18 }
 0x118   : > { %v583_v23 = vadd.f32 %v1705_v21, %v544_v57  ;;  %v599_v63 = vadd.f32 %v1705_v21, %v560_v42  ;;  %v1151_v2 = vsel %vm1745_vm7, %v880_v41, %v1381_v54  ;;  %v581_v6 = vadd.f32 %v1705_v21, %v542_v58  ;;  %v1384_v41 = vld [vmem:[%s1641_s26 + $0x50] sm:$0x1] }
 0x119   : > { %v1013_v50 = vrot.slane %v1011_v53, 7  ;;  %v597_v5 = vadd.f32 %v1705_v21, %v558_v59  ;;  %1382 = vst [vmem:[%s1641_s26 + $0x48] sm:$0xf] %v1151_v2  ;;  %v1447_v60 = vpack.c.bf16 %v612_v1, %v612_v1  ;;  %v628_v61 = vmax.f32 %v596_v56, 0.0  ;;  %v1424_v53 = vld [vmem:[%s1641_s26 + $0xb0] sm:$0x1] }
 0x11a   : > { %v615_v8 = vmax.f32 %v583_v23, 0.0  ;;  %v631_v13 = vmax.f32 %v599_v63, 0.0  ;;  %v613_v10 = vmax.f32 %v581_v6, 0.0  ;;  %v1379_v63 = vld [vmem:[%s1641_s26 + $0x44] sm:$0x1] }
 0x11b   : > { %v1016_v16 = vor.u32 %v1014_v55, %v1013_v50  ;;  %v1017_v9 = vrot.slane %v1013_v50, 4  ;;  %v629_v20 = vmax.f32 %v597_v5, 0.0  ;;  %v858_v17 = vshrl.u32 %v1447_v60, 16 }
 0x11c   : > { %v861_v22 = vshll.u32 %v1447_v60, 16  ;;  %v1463_v24 = vpack.c.bf16 %v628_v61, %v628_v61  ;;  %v1450_v25 = vpack.c.bf16 %v615_v8, %v615_v8  ;;  %v1466_v27 = vpack.c.bf16 %v631_v13, %v631_v13  ;;  %v1419_v13 = vld [vmem:[%s1641_s26 + $0xa4] sm:$0x1] }
 0x11d   : > { %v1207_v3 = vsel %vm1745_vm7, %v1016_v16, %v1421_v7  ;;  %v1448_v26 = vpack.c.bf16 %v613_v10, %v613_v10  ;;  %v1464_v31 = vpack.c.bf16 %v629_v20, %v629_v20  ;;  %v860_v32 = vrot.slane %v858_v17, 7 }
 0x11e   : > { %1422 = vst [vmem:[%s1641_s26 + $0xa8] sm:$0xf] %v1207_v3  ;;  %v994_v34 = vshrl.u32 %v1463_v24, 16  ;;  %v997_v36 = vshll.u32 %v1463_v24, 16  ;;  %v883_v47 = vshrl.u32 %v1450_v25, 16  ;;  %v886_v12 = vshll.u32 %v1450_v25, 16 }
 0x11f   : > { %v1019_v4 = vshrl.u32 %v1466_v27, 16  ;;  %v1022_v40 = vshll.u32 %v1466_v27, 16  ;;  %v866_v14 = vshrl.u32 %v1448_v26, 16  ;;  %v863_v44 = vor.u32 %v861_v22, %v860_v32 }
 0x120   : > { %v864_v45 = vrot.slane %v860_v32, 4  ;;  %v996_v0 = vrot.slane %v994_v34, 7  ;;  %v885_v15 = vrot.slane %v883_v47, 7  ;;  %v869_v18 = vshll.u32 %v1448_v26, 16 }
 0x121   : > { %v1021_v49 = vrot.slane %v1019_v4, 7  ;;  %v868_v33 = vrot.slane %v866_v14, 7  ;;  %v1002_v54 = vshrl.u32 %v1464_v31, 16  ;;  %v1144_v57 = vsel %vm1745_vm7, %v863_v44, %v1376_v37 }
 0x122   : > { %v999_v42 = vor.u32 %v997_v36, %v996_v0  ;;  %v1000_v58 = vrot.slane %v996_v0, 4  ;;  %v888_v59 = vor.u32 %v886_v12, %v885_v15  ;;  %1377 = vst [vmem:[%s1641_s26 + $0x3c] sm:$0xf] %v1144_v57  ;;  %v890_v55 = vrot.slane %v885_v15, 4 }
 0x123   : > { %v1024_v1 = vor.u32 %v1022_v40, %v1021_v49  ;;  %v1026_v56 = vrot.slane %v1021_v49, 4  ;;  %v871_v23 = vor.u32 %v869_v18, %v868_v33  ;;  %v873_v6 = vrot.slane %v868_v33, 4 }
 0x124   : > { %v1200_v2 = vsel %vm1745_vm7, %v999_v42, %v1416_v48  ;;  %v889_v50 = vsel %vm1766_vm8, %v881_v46, %v888_v59  ;;  %v1004_v5 = vrot.slane %v1002_v54, 7  ;;  %v1155_v7 = vsel %vm1776_vm9, %v890_v55, %v1384_v41  ;;  %v1391_v42 = vld [vmem:[%s1641_s26 + $0x60] sm:$0xf] }
 0x125   : > { %1417 = vst [vmem:[%s1641_s26 + $0x9c] sm:$0xf] %v1200_v2  ;;  %1383 = vst [vmem:[%s1641_s26 + $0x4c] sm:$0xf] %v889_v50  ;;  %v1025_v60 = vsel %vm1766_vm8, %v1017_v9, %v1024_v1  ;;  %v1211_v61 = vsel %vm1776_vm9, %v1026_v56, %v1424_v53  ;;  %v872_v8 = vsel %vm1766_vm8, %v864_v45, %v871_v23  ;;  %v1005_v16 = vshll.u32 %v1464_v31, 16 }
 0x126   : > { %1385 = vst [vmem:[%s1641_s26 + $0x50] sm:$0x1] %v1155_v7  ;;  %1423 = vst [vmem:[%s1641_s26 + $0xac] sm:$0xf] %v1025_v60  ;;  %v1148_v46 = vsel %vm1776_vm9, %v873_v6, %v1379_v63  ;;  %v1009_v10 = vrot.slane %v1004_v5, 4  ;;  %v547_v9 = vmul.f32 %v1836_v29, %v1700_v19  ;;  %v563_v20 = vmul.f32 %v1845_v38, %v1700_v19 }
 0x127   : > { %1425 = vst [vmem:[%s1641_s26 + $0xb0] sm:$0x1] %v1211_v61  ;;  %1378 = vst [vmem:[%s1641_s26 + $0x40] sm:$0xf] %v872_v8  ;;  %v545_v17 = vmul.f32 %v1700_v19, %v1847_v39  ;;  %v561_v22 = vmul.f32 %v1700_v19, %v1851_v43  ;;  %v548_v24 = vmul.f32 %v1853_v28, %v1700_v19  ;;  %v1431_v55 = vld [vmem:[%s1641_s26 + $0xc0] sm:$0xf] }
 0x128   : > { %1380 = vst [vmem:[%s1641_s26 + $0x44] sm:$0x1] %v1148_v46  ;;  %v1007_v25 = vor.u32 %v1005_v16, %v1004_v5  ;;  %v1204_v3 = vsel %vm1776_vm9, %v1009_v10, %v1419_v13  ;;  %v586_v29 = vadd.f32 %v1705_v21, %v547_v9  ;;  %v564_v27 = vmul.f32 %v1855_v51, %v1700_v19  ;;  %v1386_v2 = vld [vmem:[%s1641_s26 + $0x54] sm:$0xf]  ;;  %v1394_v9 = vld [vmem:[%s1641_s26 + $0x68] sm:$0x1] }
 0x129   : > { %1420 = vst [vmem:[%s1641_s26 + $0xa4] sm:$0x1] %v1204_v3  ;;  %v602_v38 = vadd.f32 %v1705_v21, %v563_v20  ;;  %v584_v39 = vadd.f32 %v1705_v21, %v545_v17  ;;  %v600_v26 = vadd.f32 %v1705_v21, %v561_v22  ;;  %v587_v43 = vadd.f32 %v1705_v21, %v548_v24  ;;  %v1426_v61 = vld [vmem:[%s1641_s26 + $0xb4] sm:$0xf]  ;;  %v1434_v3 = vld [vmem:[%s1641_s26 + $0xc8] sm:$0x1] }
 0x12a   : > { %v1008_v28 = vsel %vm1766_vm8, %v1000_v58, %v1007_v25  ;;  %v618_v31 = vmax.f32 %v586_v29, 0.0  ;;  %v603_v32 = vadd.f32 %v1705_v21, %v564_v27  ;;  %v546_v34 = vmul.f32 %v1700_v19, %v1857_v52 }
 0x12b   : > { %1418 = vst [vmem:[%s1641_s26 + $0xa0] sm:$0xf] %v1008_v28  ;;  %v634_v51 = vmax.f32 %v602_v38, 0.0  ;;  %v616_v36 = vmax.f32 %v584_v39, 0.0  ;;  %v632_v47 = vmax.f32 %v600_v26, 0.0  ;;  %v619_v37 = vmax.f32 %v587_v43, 0.0 }
 0x12c   : > { %v1453_v12 = vpack.c.bf16 %v618_v31, %v618_v31  ;;  %v635_v4 = vmax.f32 %v603_v32, 0.0  ;;  %v585_v40 = vadd.f32 %v1705_v21, %v546_v34  ;;  %v562_v8 = vmul.f32 %v1700_v19, %v1865_v62 }
 0x12d   : > { %v1469_v14 = vpack.c.bf16 %v634_v51, %v634_v51  ;;  %v1451_v44 = vpack.c.bf16 %v616_v36, %v616_v36  ;;  %v1467_v45 = vpack.c.bf16 %v632_v47, %v632_v47  ;;  %v1454_v0 = vpack.c.bf16 %v619_v37, %v619_v37  ;;  %v1389_v36 = vld [vmem:[%s1641_s26 + $0x5c] sm:$0x1] }
 0x12e   : > { %v909_v15 = vshrl.u32 %v1453_v12, 16  ;;  %v912_v48 = vshll.u32 %v1453_v12, 16  ;;  %v1470_v49 = vpack.c.bf16 %v635_v4, %v635_v4  ;;  %v617_v54 = vmax.f32 %v585_v40, 0.0 }
 0x12f   : > { %v1045_v52 = vshrl.u32 %v1469_v14, 16  ;;  %v1048_v33 = vshll.u32 %v1469_v14, 16  ;;  %v892_v18 = vshrl.u32 %v1451_v44, 16  ;;  %v895_v58 = vshll.u32 %v1451_v44, 16 }
 0x130   : > { %v911_v57 = vrot.slane %v909_v15, 7  ;;  %v1028_v59 = vshrl.u32 %v1467_v45, 16  ;;  %v917_v41 = vshrl.u32 %v1454_v0, 16  ;;  %v1031_v56 = vshll.u32 %v1467_v45, 16 }
 0x131   : > { %v1047_v53 = vrot.slane %v1045_v52, 7  ;;  %v894_v1 = vrot.slane %v892_v18, 7  ;;  %v1053_v23 = vshrl.u32 %v1470_v49, 16  ;;  %v920_v5 = vshll.u32 %v1454_v0, 16  ;;  %v1429_v0 = vld [vmem:[%s1641_s26 + $0xbc] sm:$0x1] }
 0x132   : > { %v914_v63 = vor.u32 %v912_v48, %v911_v57  ;;  %v1030_v50 = vrot.slane %v1028_v59, 7  ;;  %v919_v6 = vrot.slane %v917_v41, 7  ;;  %v915_v13 = vrot.slane %v911_v57, 4 }
 0x133   : > { %v1050_v7 = vor.u32 %v1048_v33, %v1047_v53  ;;  %v897_v60 = vor.u32 %v895_v58, %v894_v1  ;;  %v1055_v19 = vrot.slane %v1053_v23, 7  ;;  %v1056_v25 = vshll.u32 %v1470_v49, 16 }
 0x134   : > { %v1165_v46 = vsel %vm1745_vm7, %v914_v63, %v1391_v42  ;;  %v1033_v16 = vor.u32 %v1031_v56, %v1030_v50  ;;  %v922_v10 = vor.u32 %v920_v5, %v919_v6  ;;  %v924_v22 = vrot.slane %v919_v6, 4 }
 0x135   : > { %1392 = vst [vmem:[%s1641_s26 + $0x60] sm:$0xf] %v1165_v46  ;;  %v1221_v20 = vsel %vm1745_vm7, %v1050_v7, %v1431_v55  ;;  %v1158_v17 = vsel %vm1745_vm7, %v897_v60, %v1386_v2  ;;  %v1452_v29 = vpack.c.bf16 %v617_v54, %v617_v54  ;;  %v1060_v38 = vrot.slane %v1055_v19, 4 }
 0x136   : > { %1432 = vst [vmem:[%s1641_s26 + $0xc0] sm:$0xf] %v1221_v20  ;;  %1387 = vst [vmem:[%s1641_s26 + $0x54] sm:$0xf] %v1158_v17  ;;  %v1214_v62 = vsel %vm1745_vm7, %v1033_v16, %v1426_v61  ;;  %v923_v24 = vsel %vm1766_vm8, %v915_v13, %v922_v10  ;;  %v1169_v27 = vsel %vm1776_vm9, %v924_v22, %v1394_v9  ;;  %v1051_v26 = vrot.slane %v1047_v53, 4 }
 0x137   : > { %1427 = vst [vmem:[%s1641_s26 + $0xb4] sm:$0xf] %v1214_v62  ;;  %1393 = vst [vmem:[%s1641_s26 + $0x64] sm:$0xf] %v923_v24  ;;  %v601_v39 = vadd.f32 %v1705_v21, %v562_v8  ;;  %v1058_v11 = vor.u32 %v1056_v25, %v1055_v19  ;;  %v900_v43 = vshrl.u32 %v1452_v29, 16  ;;  %v1225_v28 = vsel %vm1776_vm9, %v1060_v38, %v1434_v3 }
 0x138   : > { %1395 = vst [vmem:[%s1641_s26 + $0x68] sm:$0x1] %v1169_v27  ;;  %1435 = vst [vmem:[%s1641_s26 + $0xc8] sm:$0x1] %v1225_v28  ;;  %v903_v51 = vshll.u32 %v1452_v29, 16  ;;  %v898_v47 = vrot.slane %v894_v1, 4 }
 0x139   : > { %v633_v31 = vmax.f32 %v601_v39, 0.0  ;;  %v1059_v32 = vsel %vm1766_vm8, %v1051_v26, %v1058_v11  ;;  %v902_v34 = vrot.slane %v900_v43, 7  ;;  %v1034_v15 = vrot.slane %v1030_v50, 4 }
 0x13a   : > { %1433 = vst [vmem:[%s1641_s26 + $0xc4] sm:$0xf] %v1059_v32 }
 0x13b   : > { %v1468_v21 = vpack.c.bf16 %v633_v31, %v633_v31  ;;  %v905_v37 = vor.u32 %v903_v51, %v902_v34  ;;  %v907_v12 = vrot.slane %v902_v34, 4 }
 0x13d   : > { %v1036_v4 = vshrl.u32 %v1468_v21, 16  ;;  %v906_v40 = vsel %vm1766_vm8, %v898_v47, %v905_v37  ;;  %v1162_v14 = vsel %vm1776_vm9, %v907_v12, %v1389_v36  ;;  %v1039_v45 = vshll.u32 %v1468_v21, 16 }
 0x13e   : > { %1388 = vst [vmem:[%s1641_s26 + $0x58] sm:$0xf] %v906_v40  ;;  %1390 = vst [vmem:[%s1641_s26 + $0x5c] sm:$0x1] %v1162_v14 }
 0x13f   : > { %v1038_v44 = vrot.slane %v1036_v4, 7 }
 0x141   : > { %v1041_v48 = vor.u32 %v1039_v45, %v1038_v44  ;;  %v1043_v49 = vrot.slane %v1038_v44, 4 }
 0x143   : > { %v1042_v52 = vsel %vm1766_vm8, %v1034_v15, %v1041_v48  ;;  %v1218_v33 = vsel %vm1776_vm9, %v1043_v49, %v1429_v0 }
 0x144   : > { %1428 = vst [vmem:[%s1641_s26 + $0xb8] sm:$0xf] %v1042_v52  ;;  %1430 = vst [vmem:[%s1641_s26 + $0xbc] sm:$0x1] %v1218_v33 }
 0x145 PF: > { %s14_s15 = sadd.s32 1, %s1558_s15  }
 0x146   : > { %p11_p4 = scmp.ge.s32.totalorder %s14_s15, 4  }
 0x148   :  { %13 = sbr.rel (!%p11_p4) target bundleno = 1 (0x1), region = 67 }

</bundles_post_ra>
